<compile_context>
chip_gen: v7x
topology: tpu7x:2x2x1
jax: 0.10.0
libtpu: 0.0.40
codegen_flags: <defaults>
</compile_context>

<pallas_src>
import math

import jax
import jax.numpy as jnp
from jax.experimental import pallas as pl
from jax.experimental.pallas import tpu as pltpu


# ---------------------------------------------------------------------------
# Host-side shape logic (mirrors the PyTorch module; no tensor compute).
# ---------------------------------------------------------------------------
def _is_prime(n: int) -> bool:
    if n <= 1:
        return False
    for i in range(2, int(math.sqrt(n)) + 1):
        if n % i == 0:
            return False
    return True


def _factorize_to_get_h(tokens_per_timestep: int) -> int:
    primes = [2, 3, 5, 7, 11]
    i = 0
    j = primes[0]
    value = tokens_per_timestep
    dividers = []
    while not _is_prime(value):
        if value % j == 0:
            value //= j
            dividers.append(j)
        else:
            i += 1
            j = primes[i]
    return int(math.prod(dividers) / 2)


def process_channel_list(channel_list: list[int]) -> list[int]:
    # ReshapeTokensToImage.process_channel_list is the identity.
    return list(channel_list)


# ---------------------------------------------------------------------------
# Tiling selection
# ---------------------------------------------------------------------------
def _choose_channel_chunk(T: int, HW: int, E: int, itemsize: int,
                          chunk_budget: int) -> tuple[int, int]:
    """Split the output channel axis (T*E) into uniform chunks.

    Returns (n_sub, chunks_per_t):
      * n_sub        timesteps per chunk (T-chunking); divides T.
      * chunks_per_t E-chunks per timestep (E-chunking); divides E.
    At most one of them is > 1.  Channels per chunk CC = n_sub * (E // chunks_per_t).
    """
    slab_t = HW * E * itemsize                    # one (HW, E) timestep tile
    if E % 8 != 0:
        # Tiling the channel dim below T*E would violate the (8, _) sublane
        # constraint on the output block; keep a single chunk.
        # TODO(synk): pathological case (huge HW*E with E not a multiple of 8).
        return T, 1
    if slab_t <= chunk_budget:
        for d in range(T, 0, -1):                 # largest divisor of T that fits
            if T % d == 0 and d * slab_t <= chunk_budget:
                return d, 1
        return 1, 1
    if E % 128 == 0:
        for k in range(E // 128, 0, -1):          # largest 128-multiple of E that fits
            cc = k * 128
            if E % cc == 0 and HW * cc * itemsize <= chunk_budget:
                return 1, E // cc
        return 1, E // 128                        # best effort: 128-wide chunks
    return 1, 1                                   # best effort: one timestep per chunk


# ---------------------------------------------------------------------------
# Pallas kernel
# ---------------------------------------------------------------------------
def _make_reshape_kernel(B_TILE: int, HW: int, cols: int, cls_offset: int,
                         n_sub: int, chunks_per_t: int):
    """cols = channels delivered per (batch, timestep) DMA unit; CC = n_sub*cols."""
    n_units = B_TILE * n_sub                      # DMA units per grid step

    def kernel(x_hbm, o_ref, buf, sem):
        # x_hbm: (B, N, E) raw HBM ref (pl.ANY) -- never read directly, DMA only.
        # o_ref: (B_TILE, n_sub*cols, HW) VMEM output block (lane-dense last dim).
        # buf:   (2, HW, cols) VMEM double buffer.   sem: (2,) DMA semaphores.
        bi = pl.program_id(0)                     # batch-tile index
        j = pl.program_id(1)                      # channel-chunk index
        if chunks_per_t == 1:                     # T-chunking (full E per unit)
            t0 = j * n_sub
            col0 = 0
        else:                                     # E-chunking (n_sub == 1)
            t0 = j // chunks_per_t
            col0 = (j % chunks_per_t) * cols

        def unit_copy(u, slot):
            bb, tt = divmod(u, n_sub)
            # DMA absorbs the CLS offset: arbitrary element offsets are free in
            # HBM, so no sublane re-layout of the token tile is ever needed.
            src = x_hbm.at[bi * B_TILE + bb,
                           pl.ds(cls_offset + (t0 + tt) * HW, HW),
                           pl.ds(col0, cols)]
            return pltpu.make_async_copy(src, buf.at[slot], sem.at[slot])

        unit_copy(0, 0).start()
        for u in range(n_units):                  # small static trip count
            slot = u & 1
            if u + 1 < n_units:
                unit_copy(u + 1, 1 - slot).start()
            unit_copy(u, slot).wait()
            bb, tt = divmod(u, n_sub)
            # (HW, cols) -> (cols, HW): XLU transpose, lane-dense store.
            o_ref[bb, tt * cols:(tt + 1) * cols, :] = buf[slot].T

    return kernel


# ---------------------------------------------------------------------------
# Wrapper
# ---------------------------------------------------------------------------
def reshape_tokens_to_image_single(
    x: jax.Array,
    *,
    remove_cls_token: bool = True,
    effective_time_dim: int = 1,
    h: int | None = None,
    step_budget_bytes: int | None = None,
) -> jax.Array:
    """Pallas equivalent of ReshapeTokensToImage.forward for a single feature."""
    B = x.shape[0]
    E = x.shape[-1]

    # CLS removal is a pure element offset in the collapsed token dim.  For
    # >3D inputs, removing index 0 of dim 1 *before* collapsing is the same as
    # skipping prod(shape[2:-1]) collapsed rows -- so no HBM slice copy here.
    if remove_cls_token:
        cls_offset = int(math.prod(x.shape[2:-1])) if x.ndim > 3 else 1
    else:
        cls_offset = 0
    x = x.reshape(B, -1, E)                       # collapse_dims: metadata only
    N = x.shape[1]

    T = effective_time_dim
    n_tokens = N - cls_offset
    tokens_per_timestep = n_tokens // T
    # Note: `h or ...` treats h=0 as "not provided" (same quirk as PyTorch).
    hh = h or math.sqrt(tokens_per_timestep)
    hh = int(hh) if hh - int(hh) == 0 else _factorize_to_get_h(tokens_per_timestep)
    ww = tokens_per_timestep // hh
    HW = hh * ww

    itemsize = jnp.dtype(x.dtype).itemsize

    # --- per-step VMEM budget (v7x has only 64 MiB physical per TC) ----------
    try:
        phys_vmem = int(pltpu.get_tpu_info().vmem_capacity_bytes)
    except Exception:                             # conservative fallback
        phys_vmem = 64 << 20
    if step_budget_bytes is None:
        step_budget_bytes = min(24 << 20, phys_vmem // 4)
    chunk_budget = max(step_budget_bytes // 6, 1)

    n_sub, chunks_per_t = _choose_channel_chunk(T, HW, E, itemsize, chunk_budget)

    def _cc_bytes(ns, cpt):
        return ns * (E // cpt) * HW * itemsize

    # Batch tile: amortize the ~0.35us per-grid-step overhead by moving a few
    # MiB per step for small features.
    out_target = min(4 << 20, max(step_budget_bytes // 3, 1))
    bt = 1
    for d in range(B, 0, -1):
        if B % d == 0 and d * _cc_bytes(n_sub, chunks_per_t) <= out_target:
            bt = d
            break

    # Give the v7x megacore (2 TensorCores) at least 2 parallel grid steps.
    if (B // bt) * ((T // n_sub) * chunks_per_t) < 2:
        if B > 1:
            bt = next(d for d in range(B // 2, 0, -1) if B % d == 0)
        elif n_sub == T and T > 1:
            n_sub = next(d for d in range(T // 2, 0, -1) if T % d == 0)
        elif n_sub == 1 and chunks_per_t == 1 and E % 256 == 0:
            chunks_per_t = 2
        # else: a single tiny step; nothing worth splitting.

    cols = E // chunks_per_t                      # channels per DMA unit
    CC = n_sub * cols                             # channels per output block
    n_chunks = (T // n_sub) * chunks_per_t
    n_b_tiles = B // bt

    # VMEM footprint: double-buffered DMA scratch + Pallas-double-buffered output.
    in_buf_bytes = 2 * HW * cols * itemsize
    out_block_bytes = bt * CC * HW * itemsize
    footprint = in_buf_bytes + 2 * out_block_bytes
    vmem_limit = int(min(max(footprint + (2 << 20), 16 << 20),
                         max(phys_vmem - (8 << 20), 16 << 20)))

    kernel = _make_reshape_kernel(bt, HW, cols, cls_offset, n_sub, chunks_per_t)

    out_flat = pl.pallas_call(
        kernel,
        out_shape=jax.ShapeDtypeStruct((B, T * E, HW), x.dtype),
        grid=(n_b_tiles, n_chunks),
        in_specs=[pl.BlockSpec(memory_space=pl.ANY)],   # raw HBM ref; manual DMA
        out_specs=pl.BlockSpec((bt, CC, HW), lambda bi, j: (bi, j, 0)),
        scratch_shapes=[
            pltpu.VMEM((2, HW, cols), x.dtype),
            pltpu.SemaphoreType.DMA((2,)),
        ],
        compiler_params=pltpu.CompilerParams(
            dimension_semantics=("parallel", "parallel"),
            vmem_limit_bytes=vmem_limit,
        ),
        cost_estimate=pl.CostEstimate(
            flops=0,
            transcendentals=0,
            bytes_accessed=2 * B * T * HW * E * itemsize,
        ),
    )(x)

    # Free metadata reshape of a contiguous array: (B, T*E, H*W) -> (B, T*E, H, W).
    return out_flat.reshape(B, T * E, hh, ww)


def reshape_tokens_to_image(
    features: list[jax.Array],
    *,
    remove_cls_token: bool = True,
    effective_time_dim: int = 1,
    h: int | None = None,
    step_budget_bytes: int | None = None,
) -> list[jax.Array]:
    """Module forward: process each feature in the list (shapes may differ)."""
    return [
        reshape_tokens_to_image_single(
            f,
            remove_cls_token=remove_cls_token,
            effective_time_dim=effective_time_dim,
            h=h,
            step_budget_bytes=step_budget_bytes,
        )
        for f in features
    ]


# ---------------------------------------------------------------------------
# Pure-JAX reference (exact forward semantics) for verification.
# ---------------------------------------------------------------------------
def _reference_single(x, *, remove_cls_token=True, effective_time_dim=1, h=None):
    B = x.shape[0]
    E = x.shape[-1]
    if remove_cls_token:
        x = x[:, 1:]
    x = x.reshape(B, -1, E)
    T = effective_time_dim
    tpt = x.shape[1] // T
    hh = h or math.sqrt(tpt)
    hh = int(hh) if hh - int(hh) == 0 else _factorize_to_get_h(tpt)
    ww = tpt // hh
    y = x.reshape(B, T, hh, ww, E)
    y = jnp.transpose(y, (0, 1, 4, 2, 3))          # b t e h w
    return y.reshape(B, T * E, hh, ww)


if __name__ == "__main__":
    key = jax.random.PRNGKey(0)
    ks = jax.random.split(key, 8)

    def check(got, want):
        got = jax.block_until_ready(got)
        assert got.shape == want.shape and got.dtype == want.dtype, (got.shape, want.shape)
        assert jnp.array_equal(got, want), "mismatch vs reference"

    B = 2
    # 1+2) ViT features with CLS token, 16x16 patch grid, two embed widths.
    f1 = jax.random.normal(ks[0], (B, 1 + 16 * 16, 128), dtype=jnp.float32)
    f2 = jax.random.normal(ks[1], (B, 1 + 16 * 16, 192), dtype=jnp.float32)
    o1, o2 = reshape_tokens_to_image([f1, f2])
    check(o1, _reference_single(f1)); assert o1.shape == (B, 128, 16, 16)
    check(o2, _reference_single(f2)); assert o2.shape == (B, 192, 16, 16)

    # 3) effective_time_dim > 1: several timesteps handled per grid step.
    T = 2
    f3 = jax.random.normal(ks[2], (B, 1 + T * 8 * 8, 96), dtype=jnp.float32)
    (o3,) = reshape_tokens_to_image([f3], effective_time_dim=T)
    check(o3, _reference_single(f3, effective_time_dim=T))
    assert o3.shape == (B, T * 96, 8, 8)

    # 4) batch of 1: channel axis is split so both v7x TensorCores get work.
    f4 = jax.random.normal(ks[3], (1, 1 + 16 * 16, 256), dtype=jnp.float32)
    (o4,) = reshape_tokens_to_image([f4])
    check(o4, _reference_single(f4)); assert o4.shape == (1, 256, 16, 16)

    # 5) >3D encoder output: CLS removal before collapsing == row offset of 64.
    f5 = jax.random.normal(ks[4], (B, 5, 64, 32), dtype=jnp.float32)
    (o5,) = reshape_tokens_to_image([f5])
    check(o5, _reference_single(f5)); assert o5.shape == (B, 32, 16, 16)

    # 6) 14x14 ViT grid (HW=196): lane-masked stores, still one flat output.
    f6 = jax.random.normal(ks[5], (B, 1 + 14 * 14, 128), dtype=jnp.float32)
    (o6,) = reshape_tokens_to_image([f6])
    check(o6, _reference_single(f6)); assert o6.shape == (B, 128, 14, 14)

    # 7) non-square token count -> factorize_to_get_h (192 tokens -> 32x6).
    f7 = jax.random.normal(ks[6], (B, 1 + 192, 64), dtype=jnp.float32)
    (o7,) = reshape_tokens_to_image([f7])
    check(o7, _reference_single(f7)); assert o7.shape == (B, 64, 32, 6)

    # 8) force a tiny VMEM budget to exercise the large-feature E-chunk split.
    f8 = jax.random.normal(ks[7], (B, 1 + 32 * 32, 256), dtype=jnp.float32)
    (o8,) = reshape_tokens_to_image([f8], step_budget_bytes=256 << 10)
    check(o8, _reference_single(f8)); assert o8.shape == (B, 256, 32, 32)

    # process_channel_list equivalent (identity, host-side only).
    assert process_channel_list([128, 192]) == [128, 192]

    print("KERNEL_OK")
</pallas_src>

<mosaic_0001>
module attributes {stable_mosaic.version = 11 : i64} {
  func.func @kernel(%arg0: i32, %arg1: i32, %arg2: memref<2x257x128xf32, #tpu.memory_space<any>>, %arg3: memref<1x128x256xf32, #tpu.memory_space<vmem>>, %arg4: memref<2x256x128xf32, #tpu.memory_space<vmem>>, %arg5: memref<2x!tpu.dma_semaphore, #tpu.memory_space<semaphore_mem>>) attributes {dimension_semantics = [#tpu.dimension_semantics<parallel>, #tpu.dimension_semantics<parallel>], iteration_bounds = array<i64: 2, 1>, scalar_prefetch = 0 : i64, scratch_operands = 2 : i64, tpu.core_type = #tpu.core_type<tc>, window_params = [{}, {transform_indices = @transform_1, window_bounds = array<i64: 1, 128, 256>}]} {
    %c1_i32 = arith.constant 1 : i32
    %0 = arith.muli %arg1, %c1_i32 : i32
    %c1_i32_0 = arith.constant 1 : i32
    %1 = arith.muli %arg0, %c1_i32_0 : i32
    %c0_i32 = arith.constant 0 : i32
    %2 = arith.addi %1, %c0_i32 : i32
    %c0_i32_1 = arith.constant 0 : i32
    %3 = arith.addi %0, %c0_i32_1 : i32
    %c256_i32 = arith.constant 256 : i32
    %4 = arith.muli %3, %c256_i32 : i32
    %c1_i32_2 = arith.constant 1 : i32
    %5 = arith.addi %c1_i32_2, %4 : i32
    %c0_i32_3 = arith.constant 0 : i32
    %c0_i32_4 = arith.constant 0 : i32
    %c0_i32_5 = arith.constant 0 : i32
    %6 = tpu.memref_slice %arg2[%2, %5, %c0_i32_5] : memref<2x257x128xf32, #tpu.memory_space<any>> -> memref<1x256x128xf32, #tpu.memory_space<any>>
    %7 = tpu.memref_squeeze %6 : memref<1x256x128xf32, #tpu.memory_space<any>> -> memref<256x128xf32, #tpu.memory_space<any>>
    %c0_i32_6 = arith.constant 0 : i32
    %c0_i32_7 = arith.constant 0 : i32
    %8 = tpu.memref_slice %arg4[%c0_i32_3, %c0_i32_6, %c0_i32_7] : memref<2x256x128xf32, #tpu.memory_space<vmem>> -> memref<1x256x128xf32, #tpu.memory_space<vmem>>
    %9 = tpu.memref_squeeze %8 : memref<1x256x128xf32, #tpu.memory_space<vmem>> -> memref<256x128xf32, #tpu.memory_space<vmem>>
    %10 = tpu.memref_slice %arg5[%c0_i32_4] : memref<2x!tpu.dma_semaphore, #tpu.memory_space<semaphore_mem>> -> memref<1x!tpu.dma_semaphore, #tpu.memory_space<semaphore_mem>>
    %11 = tpu.memref_squeeze %10 : memref<1x!tpu.dma_semaphore, #tpu.memory_space<semaphore_mem>> -> memref<!tpu.dma_semaphore, #tpu.memory_space<semaphore_mem>>
    tpu.enqueue_dma source(%7 : memref<256x128xf32, #tpu.memory_space<any>>) target(%9 : memref<256x128xf32, #tpu.memory_space<vmem>>) target_semaphore(%11 : memref<!tpu.dma_semaphore, #tpu.memory_space<semaphore_mem>>)
    %c1_i32_8 = arith.constant 1 : i32
    %12 = arith.muli %arg0, %c1_i32_8 : i32
    %c0_i32_9 = arith.constant 0 : i32
    %13 = arith.addi %12, %c0_i32_9 : i32
    %c0_i32_10 = arith.constant 0 : i32
    %14 = arith.addi %0, %c0_i32_10 : i32
    %c256_i32_11 = arith.constant 256 : i32
    %15 = arith.muli %14, %c256_i32_11 : i32
    %c1_i32_12 = arith.constant 1 : i32
    %16 = arith.addi %c1_i32_12, %15 : i32
    %c0_i32_13 = arith.constant 0 : i32
    %c0_i32_14 = arith.constant 0 : i32
    %c0_i32_15 = arith.constant 0 : i32
    %17 = tpu.memref_slice %arg2[%13, %16, %c0_i32_15] : memref<2x257x128xf32, #tpu.memory_space<any>> -> memref<1x256x128xf32, #tpu.memory_space<any>>
    %18 = tpu.memref_squeeze %17 : memref<1x256x128xf32, #tpu.memory_space<any>> -> memref<256x128xf32, #tpu.memory_space<any>>
    %c0_i32_16 = arith.constant 0 : i32
    %c0_i32_17 = arith.constant 0 : i32
    %19 = tpu.memref_slice %arg4[%c0_i32_13, %c0_i32_16, %c0_i32_17] : memref<2x256x128xf32, #tpu.memory_space<vmem>> -> memref<1x256x128xf32, #tpu.memory_space<vmem>>
    %20 = tpu.memref_squeeze %19 : memref<1x256x128xf32, #tpu.memory_space<vmem>> -> memref<256x128xf32, #tpu.memory_space<vmem>>
    %21 = tpu.memref_slice %arg5[%c0_i32_14] : memref<2x!tpu.dma_semaphore, #tpu.memory_space<semaphore_mem>> -> memref<1x!tpu.dma_semaphore, #tpu.memory_space<semaphore_mem>>
    %22 = tpu.memref_squeeze %21 : memref<1x!tpu.dma_semaphore, #tpu.memory_space<semaphore_mem>> -> memref<!tpu.dma_semaphore, #tpu.memory_space<semaphore_mem>>
    tpu.wait_dma2 semaphore(%22 : memref<!tpu.dma_semaphore, #tpu.memory_space<semaphore_mem>>) src(%18 : memref<256x128xf32, #tpu.memory_space<any>>) dst(%20 : memref<256x128xf32, #tpu.memory_space<vmem>>)
    %c0 = arith.constant 0 : index
    %c0_18 = arith.constant 0 : index
    %c0_19 = arith.constant 0 : index
    %23 = vector.load %arg4[%c0, %c0_18, %c0_19] : memref<2x256x128xf32, #tpu.memory_space<vmem>>, vector<1x256x128xf32>
    %24 = vector.shape_cast %23 : vector<1x256x128xf32> to vector<256x128xf32>
    %25 = tpu.transpose %24, [1, 0] : vector<256x128xf32> -> vector<128x256xf32>
    %c0_20 = arith.constant 0 : index
    %c0_21 = arith.constant 0 : index
    %c0_22 = arith.constant 0 : index
    %26 = vector.load %arg3[%c0_20, %c0_21, %c0_22] : memref<1x128x256xf32, #tpu.memory_space<vmem>>, vector<1x128x256xf32>
    %27 = vector.shape_cast %26 : vector<1x128x256xf32> to vector<128x256xf32>
    %28 = vector.shape_cast %25 : vector<128x256xf32> to vector<1x128x256xf32>
    tpu.vector_store %arg3[%c0_20, %c0_21, %c0_22], %28 {strides = array<i32>} : memref<1x128x256xf32, #tpu.memory_space<vmem>>, vector<1x128x256xf32>,
    return
  }
  func.func @transform_1(%arg0: i32, %arg1: i32) -> (i32, i32, i32) {
    %c0_i32 = arith.constant 0 : i32
    %c0_i32_0 = arith.constant 0 : i32
    return %arg0, %arg1, %c0_i32 : i32, i32, i32
  }
}

</mosaic_0001>

<bundles_post_ra>
// kernel: tpu_custom_call.1
= control target key start
LH: loop header
LB: loop body
LE: loop exit
PB: predicated region body
PF: predicated region fallthrough
CT: control target
= control target key end

     0   :  { %6 = vsyncpa [#allocation5], 0  ;;  %s731_s0 = inlined_call_operand.vmem [shape: f32[2,257,128], index: 0, kind: input, shape index: {}]   ;;  %s732_s1 = inlined_call_operand.hbm [shape: f32[2,128,256], index: 1, kind: output, shape index: {}]  }
   0x1   :  { %8 = vsyncpa [#allocation5 + $0x1], 0  ;;  %s560_s6 = smov 0   ;;  %s562_s7 = smov 0  }
   0x2   :  { %s564_s8 = smov 0   ;;  %s566_s9 = smov 0  }
   0x3 LB: > { %s23_s10 = sadd.s32 1, %s541_s8  ;;  %s395_s11 = sadd.s32 4294967295, %s545_s9   ;;  %s545_s9 = sphi %s566_s9, %s14_s9   ;;  %s541_s8 = sphi %s564_s8, %s737_s8   ;;  %s537_s7 = sphi %s562_s7, %s736_s7   ;;  %s533_s6 = sphi %s560_s6, %s735_s6  }
   0x4   : > { %p25_p0 = scmp.ge.s32.totalorder %s23_s10, 2  ;;  %p41_p1 = scmp.ne.s32.totalorder %s537_s7, %s533_s6 }
   0x5   : > { %s32_s12 = sadd.s32 1, %s537_s7  ;;  %p42_p2 = scmp.eq.s32.totalorder %s395_s11, 1 }
   0x6   : > { %s739_s10 = smov (%p25_p0, %s23_s10), 0  ;;  %p36_p3 = scmp.eq.s32.totalorder %s545_s9, 1 }
   0x7   : > { %s27_s13 = ssub.s32 %s541_s8, %s739_s10  ;;  %p590_p6 = por %p42_p2, %p41_p1 }
   0x8   : > { %p30_p4 = scmp.eq.s32.totalorder %s27_s13, 0  ;;  %p396_p5 = scmp.ne.s32.totalorder %s27_s13, 0 }
   0x9   : > { %p397_p8 = scmp.ge.s32.totalorder %s545_s9, 2 }
   0xa   : > { %s595_s15 = scalar_select %p30_p4, %s537_s7, %s32_s12  }
   0xb   : > { %p597_p7 = por %p396_p5, %p36_p3  ;;  %51 = sbr.rel (%p397_p8) target bundleno = 230 (0xe6), region = 12 }
   0xc   : > { %s56_s17 = sand.u32 (!%p397_p8), 1, %s537_s7   ;;  %s358_s18 = smul.u32 (!%p397_p8), 264, %s541_s8 }
   0xd   : > { %s606_s19 = sshll.u32 (!%p397_p8), %s56_s17, 8 }
   0xe   : > { %s611_s22 = scalar_lea.vmem (!%p397_p8), %s731_s0, %s358_s18  ;;  %s646_s23 = scalar_lea.vmem (!%p397_p8), [#allocation4], %s606_s19 }
   0xf   : > { %v399_v0 = vld [vmem:[%s611_s22 + $0x1] sm:$0xff] (!%p397_p8)  ;;  %v400_v1 = vld [vmem:[%s611_s22 + $0x9] sm:$0xff] (!%p397_p8)  ;;  %v401_v2 = vld [vmem:[%s611_s22 + $0x11] sm:$0xff] (!%p397_p8) }
  0x10   : > { %v402_v3 = vld [vmem:[%s611_s22 + $0x19] sm:$0xff] (!%p397_p8)  ;;  %v403_v4 = vld [vmem:[%s611_s22 + $0x21] sm:$0xff] (!%p397_p8)  ;;  %v404_v5 = vld [vmem:[%s611_s22 + $0x29] sm:$0xff] (!%p397_p8) }
  0x11   : > { %v405_v6 = vld [vmem:[%s611_s22 + $0x31] sm:$0xff] (!%p397_p8)  ;;  %v406_v7 = vld [vmem:[%s611_s22 + $0x39] sm:$0xff] (!%p397_p8)  ;;  %v407_v8 = vld [vmem:[%s611_s22 + $0x41] sm:$0xff] (!%p397_p8) }
  0x12   : > { %v408_v9 = vld [vmem:[%s611_s22 + $0x49] sm:$0xff]  ;;  %v409_v10 = vld [vmem:[%s611_s22 + $0x51] sm:$0xff]  ;;  %v410_v11 = vld [vmem:[%s611_s22 + $0x59] sm:$0xff] }
  0x13   : > { %v411_v12 = vld [vmem:[%s611_s22 + $0x61] sm:$0xff]  ;;  %v412_v13 = vld [vmem:[%s611_s22 + $0x69] sm:$0xff]  ;;  %v413_v14 = vld [vmem:[%s611_s22 + $0x71] sm:$0xff] }
  0x14   : > { %v414_v15 = vld [vmem:[%s611_s22 + $0x79] sm:$0xff]  ;;  %v415_v16 = vld [vmem:[%s611_s22 + $0x81] sm:$0xff]  ;;  %v416_v17 = vld [vmem:[%s611_s22 + $0x89] sm:$0xff] }
  0x15   : > { %v417_v18 = vld [vmem:[%s611_s22 + $0x91] sm:$0xff]  ;;  %v418_v19 = vld [vmem:[%s611_s22 + $0x99] sm:$0xff]  ;;  %v419_v20 = vld [vmem:[%s611_s22 + $0xa1] sm:$0xff] }
  0x16   : > { %v420_v21 = vld [vmem:[%s611_s22 + $0xa9] sm:$0xff]  ;;  %v421_v22 = vld [vmem:[%s611_s22 + $0xb1] sm:$0xff]  ;;  %v422_v23 = vld [vmem:[%s611_s22 + $0xb9] sm:$0xff] }
  0x17   : > { %v423_v24 = vld [vmem:[%s611_s22 + $0xc1] sm:$0xff]  ;;  %v424_v25 = vld [vmem:[%s611_s22 + $0xc9] sm:$0xff]  ;;  %v425_v26 = vld [vmem:[%s611_s22 + $0xd1] sm:$0xff] }
  0x18   : > { %v426_v27 = vld [vmem:[%s611_s22 + $0xd9] sm:$0xff]  ;;  %v427_v28 = vld [vmem:[%s611_s22 + $0xe1] sm:$0xff]  ;;  %v428_v29 = vld [vmem:[%s611_s22 + $0xe9] sm:$0xff] }
  0x19   : > { %v429_v30 = vld [vmem:[%s611_s22 + $0xf1] sm:$0xff]  ;;  %v430_v31 = vld [vmem:[%s611_s22 + $0xf9] sm:$0xff] }
  0x1a   : > { %168 = vsyncadd [#allocation3], 4096  ;;  %236 = vxpose.xlu1.b32.start [1/16] %v415_v16, 128  ;;  %204 = vxpose.xlu0.b32.start [1/16] %v399_v0, 128 }
  0x1b   : > { %525 = dma.done.wait [#allocation3], 4096 }
  0x1c   : > { %526 = vsyncadd [#allocation3], 4294963200  ;;  %s439_s24 = sshll.u32 %s541_s8, 12  ;;  %s317_s25 = sshll.u32 %s646_s23, 4  ;;  %s685_s25 = int_to_ptr.vmem [resolvable:$true] %s317_s25 }
  0x1d   : > { %s683_s28 = scalar_lea.hbm %s732_s1, %s439_s24  ;;  %s691_s29 = scalar_lea.sflag [#allocation5], %s56_s17 }
  0x1e   : > { %237 = vxpose.xlu1.b32.cont [2/16] %v416_v17, 128  ;;  %205 = vxpose.xlu0.b32.cont [2/16] %v400_v1, 128  ;;  %s481_s30 = scalar_lea.vmem %s685_s25, 4096  ;;  %s547_s2 = smov [#allocation4]  }
  0x1f   : > { %p482_p9 = scmp.ne.s32.totalorder %s685_s25, %s481_s30  ;;  %s485_s3 = sshll.u32 %s547_s2, 4  ;;  %s486_s3 = int_to_ptr.vmem [resolvable:$false] %s485_s3 }
  0x20   : > { %s487_s4 = scalar_lea.vmem %s486_s3, 8192  ;;  %p488_p12 = scmp.lt.s32.totalorder %s685_s25, %s486_s3 }
  0x21   : > { %p483_p10 = pnand %p482_p9, %p597_p7  ;;  %p489_p13 = scmp.lt.s32.totalorder %s487_s4, %s481_s30 }
  0x22   : > { %238 = vxpose.xlu1.b32.cont [3/16] %v417_v18, 128  ;;  %206 = vxpose.xlu0.b32.cont [3/16] %v401_v2, 128 }
  0x23   : > { %p484_p11 = pneg %p483_p10  ;;  %p490_p0 = por %p489_p13, %p488_p12 }
  0x25   : > { %p491_p1 = pnand %p490_p0, %p484_p11 }
  0x26   : > { %239 = vxpose.xlu1.b32.cont [4/16] %v418_v19, 128  ;;  %207 = vxpose.xlu0.b32.cont [4/16] %v402_v3, 128 }
  0x2a   : > { %240 = vxpose.xlu1.b32.cont [5/16] %v419_v20, 128  ;;  %208 = vxpose.xlu0.b32.cont [5/16] %v403_v4, 128 }
  0x2e   : > { %241 = vxpose.xlu1.b32.cont [6/16] %v420_v21, 128  ;;  %209 = vxpose.xlu0.b32.cont [6/16] %v404_v5, 128 }
  0x32   : > { %242 = vxpose.xlu1.b32.cont [7/16] %v421_v22, 128  ;;  %210 = vxpose.xlu0.b32.cont [7/16] %v405_v6, 128 }
  0x36   : > { %243 = vxpose.xlu1.b32.cont [8/16] %v422_v23, 128  ;;  %211 = vxpose.xlu0.b32.cont [8/16] %v406_v7, 128 }
  0x3a   : > { %244 = vxpose.xlu1.b32.cont [9/16] %v423_v24, 128  ;;  %212 = vxpose.xlu0.b32.cont [9/16] %v407_v8, 128 }
  0x3e   : > { %245 = vxpose.xlu1.b32.cont [10/16] %v424_v25, 128  ;;  %213 = vxpose.xlu0.b32.cont [10/16] %v408_v9, 128 }
  0x42   : > { %246 = vxpose.xlu1.b32.cont [11/16] %v425_v26, 128  ;;  %214 = vxpose.xlu0.b32.cont [11/16] %v409_v10, 128 }
  0x46   : > { %247 = vxpose.xlu1.b32.cont [12/16] %v426_v27, 128  ;;  %215 = vxpose.xlu0.b32.cont [12/16] %v410_v11, 128 }
  0x4a   : > { %248 = vxpose.xlu1.b32.cont [13/16] %v427_v28, 128  ;;  %216 = vxpose.xlu0.b32.cont [13/16] %v411_v12, 128 }
  0x4e   : > { %249 = vxpose.xlu1.b32.cont [14/16] %v428_v29, 128  ;;  %217 = vxpose.xlu0.b32.cont [14/16] %v412_v13, 128 }
  0x52   : > { %250 = vxpose.xlu1.b32.cont [15/16] %v429_v30, 128  ;;  %218 = vxpose.xlu0.b32.cont [15/16] %v413_v14, 128 }
  0x56   : > { %251 = vxpose.xlu1.b32.end [16/16] %v430_v31, 128  ;;  %219 = vxpose.xlu0.b32.end [16/16] %v414_v15, 128 }
  0x9a   : > { %v252_v32 = vpop.trf.xlu1  ;;  %v220_v33 = vpop.trf.xlu0 }
  0x9b   : > { %268 = vst [vmem:[%s646_s23] sm:$0xff] %v220_v33  ;;  %269 = vst [vmem:[%s646_s23 + $0x8] sm:$0xff] %v252_v32 }
  0x9e   : > { %v253_v34 = vpop.trf.xlu1  ;;  %v221_v35 = vpop.trf.xlu0 }
  0x9f   : > { %271 = vst [vmem:[%s646_s23 + $0x18] sm:$0xff] %v253_v34  ;;  %270 = vst [vmem:[%s646_s23 + $0x10] sm:$0xff] %v221_v35 }
  0xa2   : > { %v254_v36 = vpop.trf.xlu1  ;;  %v222_v37 = vpop.trf.xlu0 }
  0xa3   : > { %273 = vst [vmem:[%s646_s23 + $0x28] sm:$0xff] %v254_v36  ;;  %272 = vst [vmem:[%s646_s23 + $0x20] sm:$0xff] %v222_v37 }
  0xa6   : > { %v255_v38 = vpop.trf.xlu1  ;;  %v223_v39 = vpop.trf.xlu0 }
  0xa7   : > { %275 = vst [vmem:[%s646_s23 + $0x38] sm:$0xff] %v255_v38  ;;  %274 = vst [vmem:[%s646_s23 + $0x30] sm:$0xff] %v223_v39 }
  0xaa   : > { %v256_v40 = vpop.trf.xlu1  ;;  %v224_v41 = vpop.trf.xlu0 }
  0xab   : > { %277 = vst [vmem:[%s646_s23 + $0x48] sm:$0xff] %v256_v40  ;;  %276 = vst [vmem:[%s646_s23 + $0x40] sm:$0xff] %v224_v41 }
  0xae   : > { %v257_v42 = vpop.trf.xlu1  ;;  %v225_v43 = vpop.trf.xlu0 }
  0xaf   : > { %279 = vst [vmem:[%s646_s23 + $0x58] sm:$0xff] %v257_v42  ;;  %278 = vst [vmem:[%s646_s23 + $0x50] sm:$0xff] %v225_v43 }
  0xb2   : > { %v258_v44 = vpop.trf.xlu1  ;;  %v226_v45 = vpop.trf.xlu0 }
  0xb3   : > { %281 = vst [vmem:[%s646_s23 + $0x68] sm:$0xff] %v258_v44  ;;  %280 = vst [vmem:[%s646_s23 + $0x60] sm:$0xff] %v226_v45 }
  0xb6   : > { %v259_v46 = vpop.trf.xlu1  ;;  %v227_v47 = vpop.trf.xlu0 }
  0xb7   : > { %283 = vst [vmem:[%s646_s23 + $0x78] sm:$0xff] %v259_v46  ;;  %282 = vst [vmem:[%s646_s23 + $0x70] sm:$0xff] %v227_v47 }
  0xba   : > { %v260_v48 = vpop.trf.xlu1  ;;  %v228_v49 = vpop.trf.xlu0 }
  0xbb   : > { %285 = vst [vmem:[%s646_s23 + $0x88] sm:$0xff] %v260_v48  ;;  %284 = vst [vmem:[%s646_s23 + $0x80] sm:$0xff] %v228_v49 }
  0xbe   : > { %v261_v50 = vpop.trf.xlu1  ;;  %v229_v51 = vpop.trf.xlu0 }
  0xbf   : > { %287 = vst [vmem:[%s646_s23 + $0x98] sm:$0xff] %v261_v50  ;;  %286 = vst [vmem:[%s646_s23 + $0x90] sm:$0xff] %v229_v51 }
  0xc2   : > { %v262_v52 = vpop.trf.xlu1  ;;  %v230_v53 = vpop.trf.xlu0 }
  0xc3   : > { %289 = vst [vmem:[%s646_s23 + $0xa8] sm:$0xff] %v262_v52  ;;  %288 = vst [vmem:[%s646_s23 + $0xa0] sm:$0xff] %v230_v53 }
  0xc6   : > { %v263_v54 = vpop.trf.xlu1  ;;  %v231_v55 = vpop.trf.xlu0 }
  0xc7   : > { %291 = vst [vmem:[%s646_s23 + $0xb8] sm:$0xff] %v263_v54  ;;  %290 = vst [vmem:[%s646_s23 + $0xb0] sm:$0xff] %v231_v55 }
  0xca   : > { %v264_v56 = vpop.trf.xlu1  ;;  %v232_v57 = vpop.trf.xlu0 }
  0xcb   : > { %293 = vst [vmem:[%s646_s23 + $0xc8] sm:$0xff] %v264_v56  ;;  %292 = vst [vmem:[%s646_s23 + $0xc0] sm:$0xff] %v232_v57 }
  0xce   : > { %v265_v58 = vpop.trf.xlu1  ;;  %v233_v59 = vpop.trf.xlu0 }
  0xcf   : > { %295 = vst [vmem:[%s646_s23 + $0xd8] sm:$0xff] %v265_v58  ;;  %294 = vst [vmem:[%s646_s23 + $0xd0] sm:$0xff] %v233_v59 }
  0xd2   : > { %v266_v60 = vpop.trf.xlu1  ;;  %v234_v61 = vpop.trf.xlu0 }
  0xd3   : > { %297 = vst [vmem:[%s646_s23 + $0xe8] sm:$0xff] %v266_v60  ;;  %296 = vst [vmem:[%s646_s23 + $0xe0] sm:$0xff] %v234_v61 }
  0xd6   : > { %v267_v62 = vpop.trf.xlu1  ;;  %v235_v63 = vpop.trf.xlu0 }
  0xd7   : > { %299 = vst [vmem:[%s646_s23 + $0xf8] sm:$0xff] %v267_v62  ;;  %298 = vst [vmem:[%s646_s23 + $0xf0] sm:$0xff] %v235_v63 }
  0xd8   : > { %494 = shalt.err (!%p491_p1)
}
  0xd9   : > { %s495_s5 = scalar_lea.hbm %s683_s28, 4096  ;;  %s499_s12 = scalar_lea.hbm %s732_s1, 8192 }
  0xda   : > { %p496_p2 = scmp.ne.s32.totalorder %s683_s28, %s495_s5  ;;  %p500_p5 = scmp.lt.u32.totalorder %s683_s28, %s732_s1 }
  0xdb   : > { %p501_p8 = scmp.lt.u32.totalorder %s499_s12, %s495_s5  ;;  %p503_p10 = scmp.lt.u32.totalorder %s495_s5, %s683_s28 }
  0xdc   : > { %p497_p3 = pnand %p496_p2, %p597_p7 }
  0xdd   : > { %p502_p9 = por %p501_p8, %p500_p5 }
  0xde   : > { %p498_p4 = pneg %p497_p3 }
  0xdf   : > { %p504_p11 = por %p503_p10, %p502_p9 }
  0xe1   : > { %p505_p12 = pnand %p504_p11, %p498_p4 }
  0xe3   : > { %508 = shalt.err (!%p505_p12)
}
  0xe4   : > { %s548_s18 = smov 256   ;;  %s549_s19 = smov 16  }
  0xe5   : > { %440 = dma.vmem_to_hbm [thread:$0]  (%p597_p7), %s685_s25, 4096, %s683_s28, %s691_s29, %s548_s18, %s548_s18, %s549_s19  }
  0xe6 PF: > { %p446_p13 = scmp.ge.s32.totalorder %s545_s9, 1  ;;  %s332_s20 = sand.u32 1, %s533_s6  }
  0xe7   : > { %s333_s21 = scalar_lea.sflag [#allocation5], %s332_s20 }
  0xe8   : > { %p443_p0 = pnand %p446_p13, %p590_p6 }
  0xea   : > { %528 = dma.done.wait (!%p443_p0), %s333_s21, 4096  }
  0xeb   : > { %530 = vsyncadd (!%p443_p0), %s333_s21, 4294963200  ;;  %s14_s9 = sadd.s32 1, %s545_s9   ;;  %s735_s6 = smov %s537_s7 }
  0xec   : > { %p11_p1 = scmp.ge.s32.totalorder %s14_s9, 3   ;;  %s736_s7 = smov %s595_s15 }
  0xed   : > { %s737_s8 = smov %s739_s10 }
  0xee   :  { %13 = sbr.rel (!%p11_p1) target bundleno = 3 (0x3), region = 88 }
  0xf5   :  { %338 = vsyncpa [#allocation5], 1 }
  0xf6   :  { %340 = vsyncpa [#allocation5 + $0x1], 1 }
  0xf7   :  { %341 = vsyncmov [#allocation3] }
  0xfa   :  { %s342_s14 = vpop.sfrf %341 }
  0xfb   :  { %p437_p6 = scmp.ne.s32.totalorder %s342_s14, 0 }
  0xfd   :  { %346 = shalt.err (%p437_p6)  }
  0xfe   :  { %348 = vsyncmov [#allocation3 + $0x1] }
 0x101   :  { %s349_s16 = vpop.sfrf %348 }
 0x102   :  { %p438_p7 = scmp.ne.s32.totalorder %s349_s16, 0 }
 0x104   :  { %353 = shalt.err (%p438_p7)  }

</bundles_post_ra>
